<compile_context>
chip_gen: v7x
topology: tpu7x:2x2x1
jax: 0.10.0
libtpu: 0.0.40
codegen_flags: <defaults>
</compile_context>

<pallas_src>
import jax
import jax.numpy as jnp
from jax.experimental import pallas as pl
from jax.experimental.pallas import tpu as pltpu

LANE = 128
TARGET_TILE_BYTES = 8 * 1024 * 1024     # ~8 MiB per x tile


def _cdiv(a, b):
    return (a + b - 1) // b


def _round_up(x, m):
    return _cdiv(x, m) * m


def _vmem_capacity_bytes():
    try:
        return int(pltpu.get_tpu_info().vmem_capacity_bytes)
    except Exception:
        return 64 << 20     # conservative fallback: v7x per-TensorCore VMEM


# ------------------------------------------------------------------ fused kernel
def _dam_kernel(alpha_ref, beta_ref, x_ref, mu_ref, o_ref):
    # alpha_ref, beta_ref: (1,) f32 scalars in SMEM.
    # x_ref: (tile_b, tile_d) tile;  mu_ref: (1, tile_d) f32 slab.
    # Steady state of the hot loop is vld / vmul / vst; the mask math (one row,
    # EUP tanh) is fully hidden under the x-tile DMA.
    a = alpha_ref[0]
    b = beta_ref[0]
    mask = jnp.maximum(jnp.tanh((a * a) * (mu_ref[...] + b)), 0.0)
    o_ref[...] = (x_ref[...] * mask.astype(x_ref.dtype)).astype(o_ref.dtype)


def dam_forward(x, mu, alpha, beta):
    """DAM forward.  x: (..., D);  mu: (D,);  alpha, beta: scalars or (1,)."""
    orig_shape = x.shape
    D = orig_shape[-1]
    x2 = x.reshape(-1, D)
    B = x2.shape[0]

    alpha = jnp.asarray(alpha, jnp.float32).reshape(1)
    beta = jnp.asarray(beta, jnp.float32).reshape(1)
    mu2d = jnp.asarray(mu, jnp.float32).reshape(1, D)

    itemsize = jnp.dtype(x.dtype).itemsize
    sublane = max(8, 32 // itemsize)            # 8 f32, 16 bf16, 32 int8/fp8

    # --- VMEM budget: leave headroom below physical capacity -------------------
    vmem_cap = _vmem_capacity_bytes()
    vmem_budget = min(max(vmem_cap - (16 << 20), 16 << 20), 48 << 20)
    target_bytes = min(TARGET_TILE_BYTES, (vmem_budget // 5) // (1 << 20) * (1 << 20))
    target_bytes = max(target_bytes, 1 << 20)

    # --- tiling ----------------------------------------------------------------
    row_bytes = D * itemsize
    if sublane * row_bytes <= target_bytes:
        # Single full-D feature block: last dim is full-extent (no 128-divisibility
        # needed), rows fully contiguous, mu slab resident across the batch loop.
        tile_d = D
        n_d = 1
        rows = max(sublane, (target_bytes // row_bytes) // sublane * sublane)
        if B <= rows:
            if B >= 2 * sublane:
                # >= 2 batch blocks so both v7x TensorCores get work.
                tile_b = _round_up(_cdiv(B, 2), sublane)
            else:
                tile_b = B          # full-extent block: exempt from sublane rule
        else:
            tile_b = rows
    else:
        # Very large D: split the lane axis into multiples of 128; any partial
        # boundary block is clipped by Pallas, so no padding is needed.
        tile_d = max(LANE, (target_bytes // (sublane * itemsize)) // LANE * LANE)
        n_d = _cdiv(D, tile_d)
        tile_b = B if B <= sublane else sublane
    n_b = _cdiv(B, tile_b)

    tile_bytes = tile_b * tile_d * itemsize
    vmem_needed = 4 * tile_bytes + 2 * tile_d * 4 + (1 << 20)   # x + out dbl-buffered + mu slab
    vmem_limit = int(min(max(vmem_needed + (8 << 20), 16 << 20), vmem_budget))

    out = pl.pallas_call(
        _dam_kernel,
        out_shape=jax.ShapeDtypeStruct((B, D), x.dtype),
        grid=(n_d, n_b),                                   # batch innermost
        in_specs=[
            pl.BlockSpec(memory_space=pltpu.MemorySpace.SMEM),    # alpha (1,)
            pl.BlockSpec(memory_space=pltpu.MemorySpace.SMEM),    # beta  (1,)
            pl.BlockSpec((tile_b, tile_d), lambda j, i: (i, j)),  # x tile
            pl.BlockSpec((1, tile_d), lambda j, i: (0, j)),       # mu slab
        ],
        out_specs=pl.BlockSpec((tile_b, tile_d), lambda j, i: (i, j)),
        compiler_params=pltpu.CompilerParams(
            dimension_semantics=("parallel", "parallel"),
            vmem_limit_bytes=vmem_limit),
    )(alpha, beta, x2, mu2d)

    return out.reshape(orig_shape)


def dam_reference(x, mu, alpha, beta):
    mask = jnp.maximum(
        jnp.tanh((jnp.asarray(alpha, jnp.float32) ** 2)
                 * (jnp.asarray(mu, jnp.float32) + jnp.asarray(beta, jnp.float32))), 0.0)
    return x * mask.astype(x.dtype)


if __name__ == "__main__":
    key = jax.random.PRNGKey(0)
    k1, k2, k3 = jax.random.split(key, 3)

    def init_params(in_dim):
        # Mirrors the module's __init__:
        #   mu = arange(in_dim)/in_dim * 5.0 ; beta = 1.0 ; alpha = 1.0
        mu = jnp.arange(in_dim, dtype=jnp.float32) / in_dim * 5.0
        beta = jnp.ones((1,), dtype=jnp.float32)
        alpha = jnp.ones((1,), dtype=jnp.float32)
        return mu, alpha, beta

    # Case 1: lane-aligned 2-D f32 input (>= 2 batch blocks).
    in_dim = 256
    mu, alpha, beta = init_params(in_dim)
    x1 = jax.random.normal(k1, (16, in_dim), dtype=jnp.float32)
    out1 = jax.block_until_ready(dam_forward(x1, mu, alpha, beta))
    ref1 = dam_reference(x1, mu, alpha, beta)
    assert out1.shape == x1.shape
    assert jnp.allclose(out1, ref1, atol=1e-6, rtol=1e-6)

    # Case 2: ragged 3-D f32 input (batch not a multiple of 8, D not a multiple of 128)
    # handled with full-extent blocks -- no padding, no output slicing.
    in_dim = 96
    mu, alpha, beta = init_params(in_dim)
    x2 = jax.random.normal(k2, (2, 5, in_dim), dtype=jnp.float32)
    out2 = jax.block_until_ready(dam_forward(x2, mu, alpha, beta))
    ref2 = dam_reference(x2, mu, alpha, beta)
    assert out2.shape == x2.shape
    assert jnp.allclose(out2, ref2, atol=1e-6, rtol=1e-6)

    # Case 3: bf16 input with a partial boundary batch block (dtype-specific sublane=16).
    in_dim = 200
    mu, alpha, beta = init_params(in_dim)
    x3 = jax.random.normal(k3, (3, 40, in_dim), dtype=jnp.float32).astype(jnp.bfloat16)
    out3 = jax.block_until_ready(dam_forward(x3, mu, alpha, beta))
    ref3 = dam_reference(x3, mu, alpha, beta)
    assert out3.shape == x3.shape
    assert jnp.allclose(out3.astype(jnp.float32), ref3.astype(jnp.float32),
                        atol=2e-2, rtol=2e-2)

    print("KERNEL_OK")
</pallas_src>

<mosaic_0001>
module attributes {stable_mosaic.version = 11 : i64} {
  func.func @_dam_kernel(%arg0: i32, %arg1: i32, %arg2: memref<1xf32, #tpu.memory_space<smem>>, %arg3: memref<1xf32, #tpu.memory_space<smem>>, %arg4: memref<8x256xf32, #tpu.memory_space<vmem>>, %arg5: memref<1x256xf32, #tpu.memory_space<vmem>>, %arg6: memref<8x256xf32, #tpu.memory_space<vmem>>) attributes {dimension_semantics = [#tpu.dimension_semantics<parallel>, #tpu.dimension_semantics<parallel>], iteration_bounds = array<i64: 1, 2>, scalar_prefetch = 0 : i64, scratch_operands = 0 : i64, tpu.core_type = #tpu.core_type<tc>, window_params = [{transform_indices = @transform_0, window_bounds = array<i64: 1>}, {transform_indices = @transform_1, window_bounds = array<i64: 1>}, {transform_indices = @transform_2, window_bounds = array<i64: 8, 256>}, {transform_indices = @transform_3, window_bounds = array<i64: 1, 256>}, {transform_indices = @transform_4, window_bounds = array<i64: 8, 256>}]} {
    %c0 = arith.constant 0 : index
    %0 = memref.load %arg2[%c0] : memref<1xf32, #tpu.memory_space<smem>>
    %c0_0 = arith.constant 0 : index
    %1 = memref.load %arg3[%c0_0] : memref<1xf32, #tpu.memory_space<smem>>
    %2 = arith.mulf %0, %0 : f32
    %c0_1 = arith.constant 0 : index
    %c0_2 = arith.constant 0 : index
    %3 = vector.load %arg5[%c0_1, %c0_2] : memref<1x256xf32, #tpu.memory_space<vmem>>, vector<1x256xf32>
    %4 = vector.broadcast %1 : f32 to vector<1x256xf32>
    %5 = arith.addf %3, %4 : vector<1x256xf32>
    %6 = vector.broadcast %2 : f32 to vector<1x256xf32>
    %7 = arith.mulf %6, %5 : vector<1x256xf32>
    %8 = math.tanh %7 : vector<1x256xf32>
    %cst = arith.constant 0.000000e+00 : f32
    %9 = vector.broadcast %cst : f32 to vector<1x256xf32>
    %10 = arith.maximumf %8, %9 : vector<1x256xf32>
    %c0_3 = arith.constant 0 : index
    %c0_4 = arith.constant 0 : index
    %11 = vector.load %arg4[%c0_3, %c0_4] : memref<8x256xf32, #tpu.memory_space<vmem>>, vector<8x256xf32>
    %12 = vector.broadcast %10 : vector<1x256xf32> to vector<8x256xf32>
    %13 = arith.mulf %11, %12 : vector<8x256xf32>
    %c0_5 = arith.constant 0 : index
    %c0_6 = arith.constant 0 : index
    %14 = vector.load %arg6[%c0_5, %c0_6] : memref<8x256xf32, #tpu.memory_space<vmem>>, vector<8x256xf32>
    tpu.vector_store %arg6[%c0_5, %c0_6], %13 {strides = array<i32>} : memref<8x256xf32, #tpu.memory_space<vmem>>, vector<8x256xf32>,
    return
  }
  func.func @transform_0(%arg0: i32, %arg1: i32) -> i32 {
    %c0_i32 = arith.constant 0 : i32
    %c0_i32_0 = arith.constant 0 : i32
    return %c0_i32 : i32
  }
  func.func @transform_1(%arg0: i32, %arg1: i32) -> i32 {
    %c0_i32 = arith.constant 0 : i32
    %c0_i32_0 = arith.constant 0 : i32
    return %c0_i32 : i32
  }
  func.func @transform_2(%arg0: i32, %arg1: i32) -> (i32, i32) {
    %c0_i32 = arith.constant 0 : i32
    return %arg1, %arg0 : i32, i32
  }
  func.func @transform_3(%arg0: i32, %arg1: i32) -> (i32, i32) {
    %c0_i32 = arith.constant 0 : i32
    %c0_i32_0 = arith.constant 0 : i32
    return %c0_i32, %arg0 : i32, i32
  }
  func.func @transform_4(%arg0: i32, %arg1: i32) -> (i32, i32) {
    %c0_i32 = arith.constant 0 : i32
    return %arg1, %arg0 : i32, i32
  }
}

</mosaic_0001>

<bundles_post_ra>
// kernel: tpu_custom_call.1
= control target key start
LH: loop header
LB: loop body
LE: loop exit
PB: predicated region body
PF: predicated region fallthrough
CT: control target
= control target key end

     0   :  { %s799_s0 = inlined_call_operand.<no memory space> [shape: f32[1], index: 0, kind: input, shape index: {}]   ;;  %s800_s1 = inlined_call_operand.<no memory space> [shape: f32[1], index: 1, kind: input, shape index: {}]   ;;  %s801_s2 = inlined_call_operand.hbm [shape: f32[16,256], index: 2, kind: input, shape index: {}]   ;;  %s802_s3 = inlined_call_operand.vmem [shape: f32[1,256], index: 3, kind: input, shape index: {}]   ;;  %s803_s4 = inlined_call_operand.hbm [shape: f32[16,256], index: 4, kind: output, shape index: {}]  }
   0x1   :  { %9 = sst [smem:[#allocation2]] %s799_s0 }
   0x2   :  { %10 = sst [smem:[#allocation3]] %s800_s1 }
   0x3   :  { %11 = vsyncpa [#allocation5], 0 }
   0x4   :  { %13 = vsyncpa [#allocation5 + $0x1], 0 }
   0x5   :  { %14 = vsyncpa [#allocation6], 0 }
   0x6   :  { %16 = vsyncpa [#allocation6 + $0x1], 0  ;;  %s624_s19 = smov 0   ;;  %s626_s20 = smov 0  }
   0x7   :  { %s628_s21 = smov 0   ;;  %s630_s22 = smov 0  }
   0x8   :  { %s632_s23 = smov 0   ;;  %s634_s24 = smov 0  }
   0x9 LB: > { %s395_s0 = sadd.s32 4294967295, %s589_s24   ;;  %s396_s1 = sadd.s32 4294967294, %s589_s24   ;;  %s589_s24 = sphi %s634_s24, %s22_s24   ;;  %s585_s23 = sphi %s632_s23, %s819_s23   ;;  %s581_s22 = sphi %s630_s22, %s818_s22   ;;  %s577_s21 = sphi %s628_s21, %s817_s21   ;;  %s573_s20 = sphi %s626_s20, %s816_s20   ;;  %s569_s19 = sphi %s624_s19, %s815_s19  }
   0xa   : > { %s31_s25 = sadd.s32 1, %s585_s23  ;;  %s85_s26 = sadd.s32 1, %s577_s21 }
   0xb   : > { %p32_p0 = scmp.ge.s32.totalorder %s31_s25, 2  ;;  %p92_p1 = scmp.ne.s32.totalorder %s577_s21, %s573_s20 }
   0xc   : > { %p93_p2 = scmp.eq.s32.totalorder %s589_s24, 0  ;;  %p98_p3 = scmp.ne.s32.totalorder %s573_s20, %s569_s19 }
   0xd   : > { %s821_s25 = smov (%p32_p0, %s31_s25), 0  ;;  %p99_p5 = scmp.eq.s32.totalorder %s395_s0, 0 }
   0xe   : > { %p665_p4 = por %p93_p2, %p92_p1  ;;  %s80_s28 = ssub.s32 %s585_s23, %s821_s25 }
   0xf   : > { %p150_p6 = scmp.eq.s32.totalorder %s395_s0, 1  ;;  %p83_p7 = scmp.eq.s32.totalorder %s80_s28, 0 }
  0x10   : > { %p671_p8 = por %p99_p5, %p98_p3  ;;  %p156_p10 = scmp.eq.s32.totalorder %s396_s1, 1 }
  0x11   : > { %p675_p9 = por %p150_p6, %p92_p1  ;;  %p425_p13 = scmp.lt.s32.totalorder %s589_s24, 2 }
  0x12   : > { %s680_s5 = scalar_select %p83_p7, %s577_s21, %s85_s26  }
  0x13   : > { %s807_s30 = scalar_select %p675_p9, 1, 0 }
  0x14   : > { %p682_p11 = por %p156_p10, %p98_p3  ;;  %s190_s7 = sand.u32 1, %s577_s21  }
  0x15   : > { %s400_s8 = sshll.u32 %s190_s7, 4  ;;  %s411_s9 = sshll.u32 %s585_s23, 8 }
  0x16   : > { %s808_s6 = scalar_select %p682_p11, 1, 0 }
  0x17   : > { %s693_s12 = scalar_lea.hbm %s801_s2, %s411_s9  ;;  %s194_s13 = scalar_lea.vmem [#allocation4], %s400_s8 }
  0x18   : > { %s204_s14 = sshll.u32 %s194_s13, 4  ;;  %p699_p0 = pnand %p425_p13, %p665_p4  ;;  %s695_s14 = int_to_ptr.vmem [resolvable:$true] %s204_s14 }
  0x19   : > { %s191_s16 = scalar_lea.sflag [#allocation5], %s190_s7  ;;  %s477_s17 = scalar_lea.hbm %s693_s12, 256 }
  0x1a   : > { %p478_p3 = scmp.ne.s32.totalorder %s693_s12, %s477_s17  ;;  %p479_p5 = pneg %p699_p0 }
  0x1b   : > { %s482_s1 = scalar_lea.hbm %s801_s2, 512  ;;  %p483_p4 = scmp.lt.u32.totalorder %s693_s12, %s801_s2 }
  0x1c   : > { %p480_p6 = pnand %p479_p5, %p478_p3  ;;  %p484_p10 = scmp.lt.u32.totalorder %s482_s1, %s477_s17 }
  0x1d   : > { %p486_p12 = scmp.lt.u32.totalorder %s477_s17, %s693_s12 }
  0x1e   : > { %p481_p7 = pneg %p480_p6  ;;  %p485_p13 = por %p484_p10, %p483_p4 }
  0x20   : > { %p487_p1 = por %p486_p12, %p485_p13 }
  0x22   : > { %p488_p2 = pnand %p487_p1, %p481_p7 }
  0x24   : > { %491 = shalt.err (!%p488_p2)
}
  0x25   : > { %s492_s28 = scalar_lea.vmem %s695_s14, 256  ;;  %s591_s7 = smov [#allocation4]  }
  0x26   : > { %p493_p3 = scmp.ne.s32.totalorder %s695_s14, %s492_s28  ;;  %s497_s8 = sshll.u32 %s591_s7, 4  ;;  %s498_s8 = int_to_ptr.vmem [resolvable:$false] %s497_s8 }
  0x27   : > { %s499_s9 = scalar_lea.vmem %s498_s8, 512  ;;  %p500_p9 = scmp.lt.s32.totalorder %s695_s14, %s498_s8 }
  0x28   : > { %p495_p6 = pnand %p493_p3, %p479_p5  ;;  %p501_p4 = scmp.lt.s32.totalorder %s499_s9, %s492_s28 }
  0x2a   : > { %p496_p11 = pneg %p495_p6  ;;  %p502_p10 = por %p501_p4, %p500_p9 }
  0x2c   : > { %p503_p12 = pnand %p502_p10, %p496_p11 }
  0x2e   : > { %506 = shalt.err (!%p503_p12)
}
  0x2f   : > { %420 = dma.hbm_to_vmem [thread:$0]  (!%p699_p0), %s693_s12, 256, %s695_s14, %s191_s16  }
  0x30   : > { %p810_p1 = scmp.lt.s32.totalorder %s589_s24, 3  ;;  %p811_p2 = scmp.ge.s32.totalorder %s589_s24, 1 }
  0x32   : > { %p210_p5 = pnand %p811_p2, %p810_p1 }
  0x33   : > { %s735_s10 = sand.u32 (!%p210_p5), 1, %s573_s20  }
  0x34   : > { %213 = sbr.rel (%p210_p5) target bundleno = 103 (0x67), region = 36  ;;  %s404_s11 = sshll.u32 (!%p210_p5), %s735_s10, 4 }
  0x35   : > { %s216_s13 = scalar_lea.sflag (!%p210_p5), [#allocation5], %s735_s10  ;;  %s219_s17 = scalar_lea.vmem (!%p210_p5), [#allocation4], %s404_s11 }
  0x3b   : > { %560 = dma.done.wait (%p671_p8), %s216_s13, 256  }
  0x3c   : > { %562 = vsyncadd (%p671_p8), %s216_s13, 4294967040  ;;  %s256_s15 = sld [smem:[#allocation3]]  ;;  %v258_v0 = vld [vmem:[%s802_s3] sm:$0x3]  ;;  %v268_v5 = vlaneseq  ;;  %s247_s29 = scalar_lea.vmem [#allocation7], %s404_s11  ;;  %v266_v12 = vld [vmem:[%s219_s17 + $0x8] sm:$0xff] }
  0x3d   : > { %s255_s12 = sld [smem:[#allocation2]]  ;;  %v265_v11 = vld [vmem:[%s219_s17] sm:$0xff]  ;;  %s299_s0 = sshll.u32 %s247_s29, 4  ;;  %s747_s0 = int_to_ptr.vmem [resolvable:$true] %s299_s0 }
  0x3e   : > { %v269_v6 = vshrl.u32 %v268_v5, 7  ;;  %s412_s1 = sshll.u32 %s581_s22, 8  ;;  %s283_s7 = scalar_lea.sflag [#allocation6], %s735_s10 }
  0x3f   : > { %s752_s28 = scalar_lea.hbm %s803_s4, %s412_s1  ;;  %s507_s8 = scalar_lea.vmem %s747_s0, 256 }
  0x40   : > { %v270_v7 = vsub.s32 0, %v269_v6  ;;  %v274_v8 = vsub.s32 1, %v269_v6  ;;  %p508_p8 = scmp.ne.s32.totalorder %s747_s0, %s507_s8  ;;  %p812_p9 = scmp.ne.s32.totalorder %s807_s30, 0 }
  0x41   : > { %s592_s22 = smov [#allocation7]  }
  0x42   : > { %v259_v1 = vstv %s256_s15  ;;  %p509_p11 = pnand %p508_p8, %p812_p9  ;;  %s511_s9 = sshll.u32 %s592_s22, 4  ;;  %s512_s9 = int_to_ptr.vmem [resolvable:$false] %s511_s9 }
  0x43   : > { %s257_s14 = smul.f32 %s255_s12, %s255_s12  ;;  %v260_v2 = vadd.f32 %v259_v1, %v258_v0  ;;  %s513_s11 = scalar_lea.vmem %s512_s9, 512 }
  0x44   : > { %p510_p0 = pneg %p509_p11  ;;  %p514_p7 = scmp.lt.s32.totalorder %s747_s0, %s512_s9 }
  0x45   : > { %v261_v3 = vstv %s257_s14  ;;  %p515_p13 = scmp.lt.s32.totalorder %s513_s11, %s507_s8 }
  0x46   : > { %v262_v4 = vmul.f32 %v261_v3, %v260_v2 }
  0x47   : > { %p516_p3 = por %p515_p13, %p514_p7 }
  0x48   : > { %475 = vtanh.f32 %v262_v4 }
  0x49   : > { %p517_p6 = pnand %p516_p3, %p510_p0 }
  0x52   : > { %v476_v9 = vpop.eup %475 }
  0x53   : > { %v264_v10 = vmax.f32 %v476_v9, 0.0 }
  0x55   : > { %v271_v13 = vrot.slane %v264_v10, %v270_v7  ;;  %v275_v14 = vrot.slane %v264_v10, %v274_v8 }
  0x57   : > { %v278_v15 = vmul.f32 %v271_v13, %v265_v11  ;;  %v279_v16 = vmul.f32 %v275_v14, %v266_v12 }
  0x59   : > { %280 = vst [vmem:[%s247_s29] sm:$0xff] %v278_v15  ;;  %281 = vst [vmem:[%s247_s29 + $0x8] sm:$0xff] %v279_v16 }
  0x5a   : > { %520 = shalt.err (!%p517_p6)
}
  0x5b   : > { %s521_s10 = scalar_lea.hbm %s752_s28, 256  ;;  %s525_s15 = scalar_lea.hbm %s803_s4, 512 }
  0x5c   : > { %p522_p4 = scmp.ne.s32.totalorder %s752_s28, %s521_s10  ;;  %p526_p1 = scmp.lt.u32.totalorder %s752_s28, %s803_s4 }
  0x5d   : > { %p527_p2 = scmp.lt.u32.totalorder %s525_s15, %s521_s10  ;;  %p529_p8 = scmp.lt.u32.totalorder %s521_s10, %s752_s28 }
  0x5e   : > { %p523_p10 = pnand %p522_p4, %p812_p9 }
  0x5f   : > { %p528_p5 = por %p527_p2, %p526_p1 }
  0x60   : > { %p524_p12 = pneg %p523_p10 }
  0x61   : > { %p530_p11 = por %p529_p8, %p528_p5 }
  0x63   : > { %p531_p0 = pnand %p530_p11, %p524_p12 }
  0x65   : > { %534 = shalt.err (!%p531_p0)
}
  0x66   : > { %415 = dma.vmem_to_hbm [thread:$0]  (%p812_p9), %s747_s0, 256, %s752_s28, %s283_s7  }
  0x67 PF: > { %s311_s16 = sand.u32 1, %s569_s19   ;;  %p813_p7 = scmp.ne.s32.totalorder %s808_s6, 0 }
  0x68   : > { %p814_p13 = scmp.ge.s32.totalorder %s589_s24, 2  ;;  %s312_s18 = scalar_lea.sflag [#allocation6], %s311_s16 }
  0x6a   : > { %p422_p3 = pnand %p814_p13, %p813_p7 }
  0x6c   : > { %564 = dma.done.wait (!%p422_p3), %s312_s18, 256  }
  0x6d   : > { %566 = vsyncadd (!%p422_p3), %s312_s18, 4294967040  ;;  %s22_s24 = sadd.s32 1, %s589_s24   ;;  %s815_s19 = smov %s573_s20 }
  0x6e   : > { %p19_p6 = scmp.ge.s32.totalorder %s22_s24, 4   ;;  %s816_s20 = smov %s577_s21 }
  0x6f   : > { %s817_s21 = smov %s680_s5  ;;  %s818_s22 = smov %s585_s23 }
  0x70   : > { %s819_s23 = smov %s821_s25  ;;  %21 = sbr.rel (!%p19_p6) target bundleno = 9 (0x9), region = 84 }
  0x77   :  { %317 = vsyncpa [#allocation5], 1 }
  0x78   :  { %319 = vsyncpa [#allocation5 + $0x1], 1 }
  0x79   :  { %320 = vsyncpa [#allocation6], 1 }
  0x7a   :  { %322 = vsyncpa [#allocation6 + $0x1], 1 }

</bundles_post_ra>
